<compile_context>
chip_gen: v5e
topology: v5e:2x2
jax: 0.10.0
libtpu: 0.0.40
codegen_flags: <defaults>
</compile_context>

<pallas_src>
import functools

import jax
import jax.numpy as jnp
from jax import lax
from jax.experimental import pallas as pl
from jax.experimental.pallas import tpu as pltpu


# ----------------------------- stage 1: q/k/v projections -----------------------------
def _qkv_proj_kernel(k_ref, v_ref, q_ref,
                     wk_ref, bk_ref, wv_ref, bv_ref, wq_ref, bq_ref,
                     kp_ref, vp_ref, qp_ref):
    # Each grid step handles one batch element: three (L, D) @ (D, D) MXU matmuls.
    kp_ref[0] = jnp.dot(k_ref[0], wk_ref[...],
                        preferred_element_type=jnp.float32) + bk_ref[...]
    vp_ref[0] = jnp.dot(v_ref[0], wv_ref[...],
                        preferred_element_type=jnp.float32) + bv_ref[...]
    qp_ref[0] = jnp.dot(q_ref[0], wq_ref[...],
                        preferred_element_type=jnp.float32) + bq_ref[...]


# ----------------------------- stage 2: scaled dot-product attention ------------------
def _attention_kernel(q_ref, k_ref, v_ref, mask_ref, attn_ref, ctx_ref, *, scale):
    # refs are (H, L, dph) / (H, Lq, Lk): batched einsum over all heads of this batch.
    s = jnp.einsum("hqd,hkd->hqk", q_ref[...], k_ref[...],
                   preferred_element_type=jnp.float32)
    s = s * scale
    s = jnp.where(mask_ref[...] != 0, -jnp.inf, s)          # masked_fill_(mask, -inf)
    m = jnp.max(s, axis=-1, keepdims=True)                  # stable softmax (dim=2)
    e = jnp.exp(s - m)
    p = e / jnp.sum(e, axis=-1, keepdims=True)
    attn_ref[...] = p                                        # dropout(p=0.0) == identity
    ctx_ref[...] = jnp.einsum("hqk,hkd->hqd", p, v_ref[...],
                              preferred_element_type=jnp.float32)


# ----------------------------- stage 3: output projection + pooling + LayerNorm -------
def _output_kernel(ctx_ref, res_ref, wf_ref, bf_ref, g_ref, b_ref, out_ref, *, eps):
    L = res_ref.shape[1]
    D = res_ref.shape[2]
    proj = jnp.dot(ctx_ref[0], wf_ref[...],
                   preferred_element_type=jnp.float32) + bf_ref[...]   # (L, D)
    r = res_ref[0] + proj                                              # residual + output
    maxp = jnp.max(r, axis=0, keepdims=True)                           # (1, D)
    meanp = jnp.sum(r, axis=0, keepdims=True) * (1.0 / L)              # (1, D)
    # LayerNorm over the concatenated [maxpool | meanpool] vector of length 2D,
    # computed from the two lane-aligned halves (no in-kernel concat).
    total = (jnp.sum(maxp, axis=-1, keepdims=True)
             + jnp.sum(meanp, axis=-1, keepdims=True))
    mu = total * (1.0 / (2.0 * D))
    var = (jnp.sum(jnp.square(maxp - mu), axis=-1, keepdims=True)
           + jnp.sum(jnp.square(meanp - mu), axis=-1, keepdims=True)) * (1.0 / (2.0 * D))
    inv = lax.rsqrt(var + eps)
    out_ref[0, 0:1, :] = (maxp - mu) * inv * g_ref[0:1, :] + b_ref[0:1, :]
    out_ref[0, 1:2, :] = (meanp - mu) * inv * g_ref[1:2, :] + b_ref[1:2, :]


# ----------------------------- wrapper --------------------------------------------------
def multi_head_attention(key, value, query, attn_mask, params, *, num_heads, eps=1e-5):
    """Forward pass of MultiHeadAttention (eval mode, dropout p=0.0)."""
    B, Lq, D = query.shape
    Lk = key.shape[1]
    dph = D // num_heads
    scale = float(dph // num_heads) ** -0.5        # (key.size(-1) // num_heads) ** -0.5
    f32 = jnp.float32

    parallel = pltpu.CompilerParams(dimension_semantics=("parallel",))
    rep2 = lambda b: (0, 0)
    per_b3 = lambda b: (b, 0, 0)
    w_spec = pl.BlockSpec((D, D), rep2)
    bias_spec = pl.BlockSpec((1, D), rep2)

    # ---- stage 1: fused q/k/v linear projections ----
    kp, vp, qp = pl.pallas_call(
        _qkv_proj_kernel,
        grid=(B,),
        in_specs=[pl.BlockSpec((1, Lk, D), per_b3),
                  pl.BlockSpec((1, Lk, D), per_b3),
                  pl.BlockSpec((1, Lq, D), per_b3),
                  w_spec, bias_spec, w_spec, bias_spec, w_spec, bias_spec],
        out_specs=[pl.BlockSpec((1, Lk, D), per_b3),
                   pl.BlockSpec((1, Lk, D), per_b3),
                   pl.BlockSpec((1, Lq, D), per_b3)],
        out_shape=[jax.ShapeDtypeStruct((B, Lk, D), f32),
                   jax.ShapeDtypeStruct((B, Lk, D), f32),
                   jax.ShapeDtypeStruct((B, Lq, D), f32)],
        compiler_params=parallel,
    )(key, value, query,
      params["wk"], params["bk"], params["wv"], params["bv"],
      params["wq"], params["bq"])

    # Layout glue in the wrapper, exactly torch's `.view(batch*heads, -1, dim_per_head)`
    # and `attn_mask.repeat(num_heads, 1, 1)`.
    kh = kp.reshape(B * num_heads, Lk, dph)
    vh = vp.reshape(B * num_heads, Lk, dph)
    qh = qp.reshape(B * num_heads, Lq, dph)
    mask_h = jnp.tile(attn_mask.astype(jnp.int32), (num_heads, 1, 1))   # (B*H, Lq, Lk)

    # ---- stage 2: per-head attention (grid over batch; all heads of a batch per step) ----
    attn, ctx_h = pl.pallas_call(
        functools.partial(_attention_kernel, scale=scale),
        grid=(B,),
        in_specs=[pl.BlockSpec((num_heads, Lq, dph), per_b3),
                  pl.BlockSpec((num_heads, Lk, dph), per_b3),
                  pl.BlockSpec((num_heads, Lk, dph), per_b3),
                  pl.BlockSpec((num_heads, Lq, Lk), per_b3)],
        out_specs=[pl.BlockSpec((num_heads, Lq, Lk), per_b3),
                   pl.BlockSpec((num_heads, Lq, dph), per_b3)],
        out_shape=[jax.ShapeDtypeStruct((B * num_heads, Lq, Lk), f32),
                   jax.ShapeDtypeStruct((B * num_heads, Lq, dph), f32)],
        compiler_params=parallel,
    )(qh, kh, vh, mask_h)

    ctx = ctx_h.reshape(B, Lq, D)          # torch: context.view(batch, -1, D)

    # ---- stage 3: final linear + residual pooling + LayerNorm ----
    gamma2 = params["gamma"].reshape(2, D)
    beta2 = params["beta"].reshape(2, D)
    out3 = pl.pallas_call(
        functools.partial(_output_kernel, eps=eps),
        grid=(B,),
        in_specs=[pl.BlockSpec((1, Lq, D), per_b3),
                  pl.BlockSpec((1, Lq, D), per_b3),
                  w_spec, bias_spec,
                  pl.BlockSpec((2, D), rep2),
                  pl.BlockSpec((2, D), rep2)],
        out_specs=pl.BlockSpec((1, 2, D), per_b3),
        out_shape=jax.ShapeDtypeStruct((B, 2, D), f32),
        compiler_params=parallel,
    )(ctx, query, params["wf"], params["bf"], gamma2, beta2)

    return out3.reshape(B, 2 * D), attn


# ----------------------------- params & pure-JAX reference ------------------------------
def init_params(key, model_dim, num_heads):
    del num_heads
    D = model_dim
    ks = jax.random.split(key, 10)
    s = 1.0 / float(jnp.sqrt(jnp.float32(D)))
    # nn.Linear stores weight as (out, in); we keep them pre-transposed to (in, out).
    w = lambda k: jax.random.normal(k, (D, D), jnp.float32) * s
    b = lambda k: jax.random.normal(k, (1, D), jnp.float32) * 0.02
    return dict(
        wk=w(ks[0]), bk=b(ks[1]),
        wv=w(ks[2]), bv=b(ks[3]),
        wq=w(ks[4]), bq=b(ks[5]),
        wf=w(ks[6]), bf=b(ks[7]),
        gamma=1.0 + 0.1 * jax.random.normal(ks[8], (2 * D,), jnp.float32),
        beta=0.1 * jax.random.normal(ks[9], (2 * D,), jnp.float32),
    )


def reference(key_t, value, query, attn_mask, params, num_heads, eps=1e-5):
    """Pure-JAX mirror of the PyTorch MultiHeadAttention.forward (eval mode)."""
    B, Lq, D = query.shape
    dph = D // num_heads
    hp = lax.Precision.HIGHEST
    k = jnp.dot(key_t, params["wk"], precision=hp) + params["bk"]
    v = jnp.dot(value, params["wv"], precision=hp) + params["bv"]
    q = jnp.dot(query, params["wq"], precision=hp) + params["bq"]
    k = k.reshape(B * num_heads, -1, dph)
    v = v.reshape(B * num_heads, -1, dph)
    q = q.reshape(B * num_heads, -1, dph)
    mask = jnp.tile(attn_mask, (num_heads, 1, 1))
    scale = float(dph // num_heads) ** -0.5
    attn = jnp.einsum("bqd,bkd->bqk", q, k, precision=hp) * scale
    attn = jnp.where(mask, -jnp.inf, attn)
    attn = jax.nn.softmax(attn, axis=2)
    context = jnp.einsum("bqk,bkd->bqd", attn, v, precision=hp)
    context = context.reshape(B, -1, D)
    output = jnp.dot(context, params["wf"], precision=hp) + params["bf"]
    r = query + output
    maxpool = jnp.max(r, axis=1)
    meanpool = jnp.mean(r, axis=1)
    agg = jnp.concatenate([maxpool, meanpool], axis=1)
    mu = jnp.mean(agg, axis=-1, keepdims=True)
    var = jnp.mean(jnp.square(agg - mu), axis=-1, keepdims=True)
    out = (agg - mu) / jnp.sqrt(var + eps) * params["gamma"] + params["beta"]
    return out, attn


if __name__ == "__main__":
    MODEL_DIM, NUM_HEADS = 128, 4      # dim_per_head = 32
    B, L = 2, 8

    root = jax.random.PRNGKey(0)
    k_par, k_k, k_v, k_q = jax.random.split(root, 4)
    params = init_params(k_par, MODEL_DIM, NUM_HEADS)

    key_t = jax.random.normal(k_k, (B, L, MODEL_DIM), jnp.float32)
    value = jax.random.normal(k_v, (B, L, MODEL_DIM), jnp.float32)
    query = jax.random.normal(k_q, (B, L, MODEL_DIM), jnp.float32)

    # Boolean mask (True = masked): causal + per-batch key padding; every row keeps >=1 key.
    valid_len = jnp.array([L, 5], dtype=jnp.int32)
    causal = jnp.triu(jnp.ones((L, L), dtype=bool), k=1)[None]            # (1, L, L)
    padding = jnp.arange(L)[None, None, :] >= valid_len[:, None, None]    # (B, 1, L)
    attn_mask = causal | padding                                          # (B, L, L)

    out, attn = multi_head_attention(key_t, value, query, attn_mask, params,
                                     num_heads=NUM_HEADS)
    out = jax.block_until_ready(out)
    attn = jax.block_until_ready(attn)

    ref_out, ref_attn = reference(key_t, value, query, attn_mask, params, NUM_HEADS)

    assert out.shape == (B, 2 * MODEL_DIM)
    assert attn.shape == (B * NUM_HEADS, L, L)
    assert jnp.allclose(attn, ref_attn, atol=1e-4, rtol=1e-4), (
        float(jnp.max(jnp.abs(attn - ref_attn))))
    assert jnp.allclose(out, ref_out, atol=2e-3, rtol=2e-3), (
        float(jnp.max(jnp.abs(out - ref_out))))

    print("KERNEL_OK")
</pallas_src>

<mosaic_0001>
module attributes {stable_mosaic.version = 11 : i64} {
  func.func @_qkv_proj_kernel(%arg0: i32, %arg1: memref<1x8x128xf32, #tpu.memory_space<vmem>>, %arg2: memref<1x8x128xf32, #tpu.memory_space<vmem>>, %arg3: memref<1x8x128xf32, #tpu.memory_space<vmem>>, %arg4: memref<128x128xf32, #tpu.memory_space<vmem>>, %arg5: memref<1x128xf32, #tpu.memory_space<vmem>>, %arg6: memref<128x128xf32, #tpu.memory_space<vmem>>, %arg7: memref<1x128xf32, #tpu.memory_space<vmem>>, %arg8: memref<128x128xf32, #tpu.memory_space<vmem>>, %arg9: memref<1x128xf32, #tpu.memory_space<vmem>>, %arg10: memref<1x8x128xf32, #tpu.memory_space<vmem>>, %arg11: memref<1x8x128xf32, #tpu.memory_space<vmem>>, %arg12: memref<1x8x128xf32, #tpu.memory_space<vmem>>) attributes {dimension_semantics = [#tpu.dimension_semantics<parallel>], iteration_bounds = array<i64: 2>, scalar_prefetch = 0 : i64, scratch_operands = 0 : i64, tpu.core_type = #tpu.core_type<tc>, window_params = [{transform_indices = @transform_0, window_bounds = array<i64: 1, 8, 128>}, {transform_indices = @transform_1, window_bounds = array<i64: 1, 8, 128>}, {transform_indices = @transform_2, window_bounds = array<i64: 1, 8, 128>}, {pipeline_mode = #tpu.pipeline_mode<synchronous>, transform_indices = @transform_3, window_bounds = array<i64: 128, 128>}, {pipeline_mode = #tpu.pipeline_mode<synchronous>, transform_indices = @transform_4, window_bounds = array<i64: 1, 128>}, {pipeline_mode = #tpu.pipeline_mode<synchronous>, transform_indices = @transform_5, window_bounds = array<i64: 128, 128>}, {pipeline_mode = #tpu.pipeline_mode<synchronous>, transform_indices = @transform_6, window_bounds = array<i64: 1, 128>}, {pipeline_mode = #tpu.pipeline_mode<synchronous>, transform_indices = @transform_7, window_bounds = array<i64: 128, 128>}, {pipeline_mode = #tpu.pipeline_mode<synchronous>, transform_indices = @transform_8, window_bounds = array<i64: 1, 128>}, {transform_indices = @transform_9, window_bounds = array<i64: 1, 8, 128>}, {transform_indices = @transform_10, window_bounds = array<i64: 1, 8, 128>}, {transform_indices = @transform_11, window_bounds = array<i64: 1, 8, 128>}]} {
    %c0 = arith.constant 0 : index
    %c0_0 = arith.constant 0 : index
    %c0_1 = arith.constant 0 : index
    %0 = vector.load %arg1[%c0, %c0_0, %c0_1] : memref<1x8x128xf32, #tpu.memory_space<vmem>>, vector<1x8x128xf32>
    %1 = vector.shape_cast %0 : vector<1x8x128xf32> to vector<8x128xf32>
    %c0_2 = arith.constant 0 : index
    %c0_3 = arith.constant 0 : index
    %2 = vector.load %arg4[%c0_2, %c0_3] : memref<128x128xf32, #tpu.memory_space<vmem>>, vector<128x128xf32>
    %cst = arith.constant dense<0.000000e+00> : vector<8x128xf32>
    %3 = tpu.matmul %1, %2, %cst {dimension_numbers = #tpu.dot_dimension_numbers<[1], [0], [0], [1], [0, 0, 1, 1], [], []>} : vector<8x128xf32>, vector<128x128xf32>, vector<8x128xf32> -> vector<8x128xf32>
    %c0_4 = arith.constant 0 : index
    %c0_5 = arith.constant 0 : index
    %4 = vector.load %arg5[%c0_4, %c0_5] : memref<1x128xf32, #tpu.memory_space<vmem>>, vector<1x128xf32>
    %5 = vector.broadcast %4 : vector<1x128xf32> to vector<8x128xf32>
    %6 = arith.addf %3, %5 : vector<8x128xf32>
    %c0_6 = arith.constant 0 : index
    %c0_7 = arith.constant 0 : index
    %c0_8 = arith.constant 0 : index
    %7 = vector.load %arg10[%c0_6, %c0_7, %c0_8] : memref<1x8x128xf32, #tpu.memory_space<vmem>>, vector<1x8x128xf32>
    %8 = vector.shape_cast %7 : vector<1x8x128xf32> to vector<8x128xf32>
    %9 = vector.shape_cast %6 : vector<8x128xf32> to vector<1x8x128xf32>
    tpu.vector_store %arg10[%c0_6, %c0_7, %c0_8], %9 {strides = array<i32>} : memref<1x8x128xf32, #tpu.memory_space<vmem>>, vector<1x8x128xf32>,
    %c0_9 = arith.constant 0 : index
    %c0_10 = arith.constant 0 : index
    %c0_11 = arith.constant 0 : index
    %10 = vector.load %arg2[%c0_9, %c0_10, %c0_11] : memref<1x8x128xf32, #tpu.memory_space<vmem>>, vector<1x8x128xf32>
    %11 = vector.shape_cast %10 : vector<1x8x128xf32> to vector<8x128xf32>
    %c0_12 = arith.constant 0 : index
    %c0_13 = arith.constant 0 : index
    %12 = vector.load %arg6[%c0_12, %c0_13] : memref<128x128xf32, #tpu.memory_space<vmem>>, vector<128x128xf32>
    %cst_14 = arith.constant dense<0.000000e+00> : vector<8x128xf32>
    %13 = tpu.matmul %11, %12, %cst_14 {dimension_numbers = #tpu.dot_dimension_numbers<[1], [0], [0], [1], [0, 0, 1, 1], [], []>} : vector<8x128xf32>, vector<128x128xf32>, vector<8x128xf32> -> vector<8x128xf32>
    %c0_15 = arith.constant 0 : index
    %c0_16 = arith.constant 0 : index
    %14 = vector.load %arg7[%c0_15, %c0_16] : memref<1x128xf32, #tpu.memory_space<vmem>>, vector<1x128xf32>
    %15 = vector.broadcast %14 : vector<1x128xf32> to vector<8x128xf32>
    %16 = arith.addf %13, %15 : vector<8x128xf32>
    %c0_17 = arith.constant 0 : index
    %c0_18 = arith.constant 0 : index
    %c0_19 = arith.constant 0 : index
    %17 = vector.load %arg11[%c0_17, %c0_18, %c0_19] : memref<1x8x128xf32, #tpu.memory_space<vmem>>, vector<1x8x128xf32>
    %18 = vector.shape_cast %17 : vector<1x8x128xf32> to vector<8x128xf32>
    %19 = vector.shape_cast %16 : vector<8x128xf32> to vector<1x8x128xf32>
    tpu.vector_store %arg11[%c0_17, %c0_18, %c0_19], %19 {strides = array<i32>} : memref<1x8x128xf32, #tpu.memory_space<vmem>>, vector<1x8x128xf32>,
    %c0_20 = arith.constant 0 : index
    %c0_21 = arith.constant 0 : index
    %c0_22 = arith.constant 0 : index
    %20 = vector.load %arg3[%c0_20, %c0_21, %c0_22] : memref<1x8x128xf32, #tpu.memory_space<vmem>>, vector<1x8x128xf32>
    %21 = vector.shape_cast %20 : vector<1x8x128xf32> to vector<8x128xf32>
    %c0_23 = arith.constant 0 : index
    %c0_24 = arith.constant 0 : index
    %22 = vector.load %arg8[%c0_23, %c0_24] : memref<128x128xf32, #tpu.memory_space<vmem>>, vector<128x128xf32>
    %cst_25 = arith.constant dense<0.000000e+00> : vector<8x128xf32>
    %23 = tpu.matmul %21, %22, %cst_25 {dimension_numbers = #tpu.dot_dimension_numbers<[1], [0], [0], [1], [0, 0, 1, 1], [], []>} : vector<8x128xf32>, vector<128x128xf32>, vector<8x128xf32> -> vector<8x128xf32>
    %c0_26 = arith.constant 0 : index
    %c0_27 = arith.constant 0 : index
    %24 = vector.load %arg9[%c0_26, %c0_27] : memref<1x128xf32, #tpu.memory_space<vmem>>, vector<1x128xf32>
    %25 = vector.broadcast %24 : vector<1x128xf32> to vector<8x128xf32>
    %26 = arith.addf %23, %25 : vector<8x128xf32>
    %c0_28 = arith.constant 0 : index
    %c0_29 = arith.constant 0 : index
    %c0_30 = arith.constant 0 : index
    %27 = vector.load %arg12[%c0_28, %c0_29, %c0_30] : memref<1x8x128xf32, #tpu.memory_space<vmem>>, vector<1x8x128xf32>
    %28 = vector.shape_cast %27 : vector<1x8x128xf32> to vector<8x128xf32>
    %29 = vector.shape_cast %26 : vector<8x128xf32> to vector<1x8x128xf32>
    tpu.vector_store %arg12[%c0_28, %c0_29, %c0_30], %29 {strides = array<i32>} : memref<1x8x128xf32, #tpu.memory_space<vmem>>, vector<1x8x128xf32>,
    return
  }
  func.func @transform_0(%arg0: i32) -> (i32, i32, i32) {
    %c0_i32 = arith.constant 0 : i32
    %c0_i32_0 = arith.constant 0 : i32
    %c0_i32_1 = arith.constant 0 : i32
    return %arg0, %c0_i32, %c0_i32_0 : i32, i32, i32
  }
  func.func @transform_1(%arg0: i32) -> (i32, i32, i32) {
    %c0_i32 = arith.constant 0 : i32
    %c0_i32_0 = arith.constant 0 : i32
    %c0_i32_1 = arith.constant 0 : i32
    return %arg0, %c0_i32, %c0_i32_0 : i32, i32, i32
  }
  func.func @transform_2(%arg0: i32) -> (i32, i32, i32) {
    %c0_i32 = arith.constant 0 : i32
    %c0_i32_0 = arith.constant 0 : i32
    %c0_i32_1 = arith.constant 0 : i32
    return %arg0, %c0_i32, %c0_i32_0 : i32, i32, i32
  }
  func.func @transform_3(%arg0: i32) -> (i32, i32) {
    %c0_i32 = arith.constant 0 : i32
    %c0_i32_0 = arith.constant 0 : i32
    %c0_i32_1 = arith.constant 0 : i32
    return %c0_i32, %c0_i32_0 : i32, i32
  }
  func.func @transform_4(%arg0: i32) -> (i32, i32) {
    %c0_i32 = arith.constant 0 : i32
    %c0_i32_0 = arith.constant 0 : i32
    %c0_i32_1 = arith.constant 0 : i32
    return %c0_i32, %c0_i32_0 : i32, i32
  }
  func.func @transform_5(%arg0: i32) -> (i32, i32) {
    %c0_i32 = arith.constant 0 : i32
    %c0_i32_0 = arith.constant 0 : i32
    %c0_i32_1 = arith.constant 0 : i32
    return %c0_i32, %c0_i32_0 : i32, i32
  }
  func.func @transform_6(%arg0: i32) -> (i32, i32) {
    %c0_i32 = arith.constant 0 : i32
    %c0_i32_0 = arith.constant 0 : i32
    %c0_i32_1 = arith.constant 0 : i32
    return %c0_i32, %c0_i32_0 : i32, i32
  }
  func.func @transform_7(%arg0: i32) -> (i32, i32) {
    %c0_i32 = arith.constant 0 : i32
    %c0_i32_0 = arith.constant 0 : i32
    %c0_i32_1 = arith.constant 0 : i32
    return %c0_i32, %c0_i32_0 : i32, i32
  }
  func.func @transform_8(%arg0: i32) -> (i32, i32) {
    %c0_i32 = arith.constant 0 : i32
    %c0_i32_0 = arith.constant 0 : i32
    %c0_i32_1 = arith.constant 0 : i32
    return %c0_i32, %c0_i32_0 : i32, i32
  }
  func.func @transform_9(%arg0: i32) -> (i32, i32, i32) {
    %c0_i32 = arith.constant 0 : i32
    %c0_i32_0 = arith.constant 0 : i32
    %c0_i32_1 = arith.constant 0 : i32
    return %arg0, %c0_i32, %c0_i32_0 : i32, i32, i32
  }
  func.func @transform_10(%arg0: i32) -> (i32, i32, i32) {
    %c0_i32 = arith.constant 0 : i32
    %c0_i32_0 = arith.constant 0 : i32
    %c0_i32_1 = arith.constant 0 : i32
    return %arg0, %c0_i32, %c0_i32_0 : i32, i32, i32
  }
  func.func @transform_11(%arg0: i32) -> (i32, i32, i32) {
    %c0_i32 = arith.constant 0 : i32
    %c0_i32_0 = arith.constant 0 : i32
    %c0_i32_1 = arith.constant 0 : i32
    return %arg0, %c0_i32, %c0_i32_0 : i32, i32, i32
  }
}

</mosaic_0001>

<bundles_post_ra>
// kernel: tpu_custom_call.1
= control target key start
LH: loop header
LB: loop body
LE: loop exit
PB: predicated region body
PF: predicated region fallthrough
CT: control target
= control target key end

     0   :  { %s1758_s0 = inlined_call_operand.hbm [shape: f32[2,8,128], index: 0, kind: input, shape index: {}]   ;;  %s1759_s1 = inlined_call_operand.hbm [shape: f32[2,8,128], index: 1, kind: input, shape index: {}]   ;;  %s1760_s2 = inlined_call_operand.hbm [shape: f32[2,8,128], index: 2, kind: input, shape index: {}]   ;;  %s1761_s3 = inlined_call_operand.hbm [shape: f32[128,128], index: 3, kind: input, shape index: {}]   ;;  %s1762_s4 = inlined_call_operand.vmem [shape: f32[1,128], index: 4, kind: input, shape index: {}]   ;;  %s1763_s5 = inlined_call_operand.hbm [shape: f32[128,128], index: 5, kind: input, shape index: {}]   ;;  %s1764_s6 = inlined_call_operand.vmem [shape: f32[1,128], index: 6, kind: input, shape index: {}]   ;;  %s1765_s7 = inlined_call_operand.hbm [shape: f32[128,128], index: 7, kind: input, shape index: {}]   ;;  %s1766_s8 = inlined_call_operand.vmem [shape: f32[1,128], index: 8, kind: input, shape index: {}]   ;;  %s1767_s9 = inlined_call_operand.hbm [shape: f32[2,8,128], index: 9, kind: output, shape index: {0}]   ;;  %s1768_s10 = inlined_call_operand.hbm [shape: f32[2,8,128], index: 10, kind: output, shape index: {1}]   ;;  %s1769_s11 = inlined_call_operand.hbm [shape: f32[2,8,128], index: 11, kind: output, shape index: {2}]  }
   0x1   :  { %1787 = sst [smem:[#allocation29_spill]] %s1759_s1 }
   0x2   :  { %1788 = sst [smem:[#allocation30_spill]] %s1761_s3 }
   0x3   :  { %1789 = sst [smem:[#allocation31_spill]] %s1762_s4 }
   0x4   :  { %1790 = sst [smem:[#allocation32_spill]] %s1766_s8 }
   0x5   :  { %1791 = sst [smem:[#allocation33_spill]] %s1769_s11 }
   0x6   :  { %17 = vsyncpa [#allocation3], 0 }
   0x7   :  { %19 = vsyncpa [#allocation3 + $0x1], 0 }
   0x8   :  { %20 = vsyncpa [#allocation6], 0 }
   0x9   :  { %22 = vsyncpa [#allocation6 + $0x1], 0 }
   0xa   :  { %23 = vsyncpa [#allocation9], 0 }
   0xb   :  { %24 = vsyncpa [#allocation12], 0 }
   0xc   :  { %25 = vsyncpa [#allocation4], 0 }
   0xd   :  { %27 = vsyncpa [#allocation4 + $0x1], 0 }
   0xe   :  { %28 = vsyncpa [#allocation15], 0 }
   0xf   :  { %30 = vsyncpa [#allocation15 + $0x1], 0  ;;  %s1449_s17 = smov 0   ;;  %s1451_s18 = smov 0  }
  0x10   :  { %s1453_s19 = smov 0   ;;  %s1455_s20 = smov 0  }
  0x11 LB: > { %1792 = sst [smem:[#allocation23_spill]] %s1370_s17  ;;  %s1473_s24 = sadd.s32 4294967295, %s1382_s20   ;;  %s1382_s20 = sphi %s1455_s20, %s1823_s20   ;;  %s1378_s19 = sphi %s1453_s19, %s1827_s19   ;;  %s1374_s18 = sphi %s1451_s18, %s1826_s18   ;;  %s1370_s17 = sphi %s1449_s17, %s1825_s17  }
  0x12   : > { %1793 = sst [smem:[#allocation24_spill]] %s1382_s20  ;;  %p933_p0 = scmp.ge.s32.totalorder %s1382_s20, 1 }
  0x13   : > { %s1794_s3 = sld [smem:[#allocation30_spill]]  ;;  %p1785_p1 = scmp.eq.s32.totalorder %s1473_s24, 0 }
  0x14   : > { %p323_p2 = scmp.lt.s32.totalorder %s1382_s20, 3  ;;  %s1384_s26 = smov [#allocation8]  }
  0x15   : > { %s336_s27 = sshll.u32 %s1384_s26, 4  ;;  %s1771_s29 = smov 128   ;;  %s337_s27 = int_to_ptr.vmem [resolvable:$true] %s336_s27 }
  0x16   : > { %p1478_p3 = pnand %p933_p0, %p323_p2  ;;  %s1773_s30 = smov 8  }
  0x17   : > { %s1770_s12 = sadd.s32 4294967294, %s1382_s20   ;;  %s1498_s13 = sadd.s32 1, %s1382_s20  }
  0x18   : > { %p986_p4 = pneg %p1478_p3  ;;  %1797 = sst [smem:[#allocation25_spill]] %s1498_s13 }
  0x19   : > { %s334_s23 = sshll.u32 %s1794_s3, 4  ;;  %s43_s14 = sadd.s32 1, %s1378_s19  ;;  %s335_s23 = int_to_ptr.hbm [resolvable:$true] %s334_s23 }
  0x1a   : > { %p1487_p6 = pnand %p986_p4, %p1785_p1  ;;  %s40_s15 = ssub.s32 %s1382_s20, %s1498_s13 }
  0x1b   : > { %p50_p7 = scmp.ne.s32.totalorder %s1378_s19, %s1374_s18  ;;  %p41_p8 = scmp.eq.s32.totalorder %s40_s15, 0 }
  0x1c   : > { %989 = dma.hbm_to_vmem [thread:$0]  (!%p1487_p6), %s335_s23, 2048, %s337_s27, [#allocation9], %s1771_s29, %s1771_s29, %s1773_s30  }
  0x1d   : > { %p51_p9 = scmp.eq.s32.totalorder %s1382_s20, 0  ;;  %p56_p10 = scmp.ne.s32.totalorder %s1374_s18, %s1370_s17 }
  0x1e   : > { %p258_p11 = scmp.eq.s32.totalorder %s1473_s24, 1  ;;  %p264_p2 = scmp.eq.s32.totalorder %s1770_s12, 1 }
  0x1f   : > { %s1510_s16 = scalar_select %p41_p8, %s1378_s19, %s43_s14  }
  0x20   : > { %p52_p12 = por %p51_p9, %p50_p7  ;;  %p1514_p13 = por %p1785_p1, %p56_p10 }
  0x21   : > { %1798 = sst [smem:[#allocation26_spill]] %s1510_s16  ;;  %p1518_p0 = por %p258_p11, %p50_p7 }
  0x22   : > { %p1019_p4 = scmp.lt.s32.totalorder %s1382_s20, 2  ;;  %s1778_s23 = sand.u32 1, %s1378_s19  }
  0x23   : > { %s1800_s22 = scalar_select %p1518_p0, 1, 0 }
  0x24   : > { %p1526_p5 = por %p264_p2, %p56_p10  ;;  %s1532_s27 = sshll.u32 %s1778_s23, 3 }
  0x25   : > { %1801 = sst [smem:[#allocation27_spill]] %s1800_s22  ;;  %s1535_s14 = sshll.u32 %s1382_s20, 3 }
  0x26   : > { %s1802_s26 = scalar_select %p1526_p5, 1, 0 }
  0x27   : > { %p1537_p8 = pnand %p1019_p4, %p52_p12  ;;  %s406_s12 = sand.u32 1, %s1382_s20  }
  0x28   : > { %1803 = sst [smem:[#allocation28_spill]] %s1802_s26  ;;  %s410_s16 = scalar_lea.vmem [#allocation5], %s1532_s27 }
  0x29   : > { %s1805_s1 = sld [smem:[#allocation29_spill]]  ;;  %s418_s13 = sshll.u32 %s410_s16, 4  ;;  %s419_s13 = int_to_ptr.vmem [resolvable:$true] %s418_s13 }
  0x2a   : > { %s351_s8 = sshll.u32 %s1763_s5, 4  ;;  %s1550_s22 = scalar_lea.sflag [#allocation6], %s406_s12  ;;  %s352_s8 = int_to_ptr.hbm [resolvable:$true] %s351_s8 }
  0x2b   : > { %p1098_p9 = pneg %p1537_p8 }
  0x2f   : > { %s414_s3 = scalar_lea.hbm %s1805_s1, %s1535_s14  ;;  %s1101_s30 = scalar_lea.hbm %s1805_s1, 16 }
  0x30   : > { %s416_s26 = sshll.u32 %s414_s3, 4  ;;  %s417_s26 = int_to_ptr.hbm [resolvable:$true] %s416_s26 }
  0x31   : > { %s1094_s11 = sshra.s32 %s417_s26, 4  ;;  %s1095_s11 = int_to_ptr.hbm [resolvable:$true] %s1094_s11 }
  0x32   : > { %s1096_s4 = scalar_lea.hbm %s1095_s11, 8  ;;  %p1102_p12 = scmp.lt.s32.totalorder %s1095_s11, %s1805_s1 }
  0x33   : > { %p1097_p7 = scmp.ne.s32.totalorder %s1095_s11, %s1096_s4  ;;  %p1103_p2 = scmp.lt.s32.totalorder %s1101_s30, %s1096_s4 }
  0x35   : > { %p1099_p10 = pnand %p1098_p9, %p1097_p7  ;;  %p1104_p4 = por %p1103_p2, %p1102_p12 }
  0x37   : > { %p1100_p11 = pneg %p1099_p10 }
  0x39   : > { %p1105_p1 = pnand %p1104_p4, %p1100_p11 }
  0x3b   : > { %1108 = shalt.err (!%p1105_p1)
}
  0x3c   : > { %1002 = dma.hbm_to_vmem [thread:$0]  (!%p1537_p8), %s417_s26, 128, %s419_s13, %s1550_s22  }
  0x3d   : > { %s1387_s17 = smov [#allocation10]   ;;  %s368_s11 = sshll.u32 %s1765_s7, 4  ;;  %s369_s11 = int_to_ptr.hbm [resolvable:$true] %s368_s11 }
  0x3e   : > { %s353_s12 = sshll.u32 %s1387_s17, 4  ;;  %s1806_s4 = smov 8   ;;  %s354_s12 = int_to_ptr.vmem [resolvable:$true] %s353_s12 }
  0x3f   : > { %s1807_s20 = smov 128   ;;  %s1388_s3 = smov [#allocation11]  }
  0x40   : > { %992 = dma.hbm_to_vmem [thread:$0]  (!%p1487_p6), %s352_s8, 2048, %s354_s12, [#allocation9], %s1807_s20, %s1807_s20, %s1806_s4  }
  0x41   : > { %s370_s30 = sshll.u32 %s1388_s3, 4  ;;  %s395_s16 = scalar_lea.hbm %s1758_s0, %s1535_s14  ;;  %s371_s30 = int_to_ptr.vmem [resolvable:$true] %s370_s30 }
  0x42   : > { %995 = dma.hbm_to_vmem [thread:$0]  (!%p1487_p6), %s369_s11, 2048, %s371_s30, [#allocation12], %s1807_s20, %s1807_s20, %s1806_s4  }
  0x43   : > { %s397_s17 = sshll.u32 %s395_s16, 4  ;;  %s391_s23 = scalar_lea.vmem [#allocation2], %s1532_s27  ;;  %s398_s17 = int_to_ptr.hbm [resolvable:$true] %s397_s17 }
  0x44   : > { %s399_s29 = sshll.u32 %s391_s23, 4  ;;  %s1808_s1 = sand.u32 1, %s1378_s19   ;;  %s400_s29 = int_to_ptr.vmem [resolvable:$true] %s399_s29 }
  0x45   : > { %s388_s8 = scalar_lea.sflag [#allocation3], %s1808_s1  ;;  %s1184_s12 = sshra.s32 %s398_s17, 4  ;;  %s1185_s12 = int_to_ptr.hbm [resolvable:$true] %s1184_s12 }
  0x46   : > { %s1186_s3 = scalar_lea.hbm %s1185_s12, 8  ;;  %s1191_s26 = scalar_lea.hbm %s1758_s0, 16 }
  0x47   : > { %p1187_p1 = scmp.ne.s32.totalorder %s1185_s12, %s1186_s3  ;;  %p1192_p6 = scmp.lt.s32.totalorder %s1185_s12, %s1758_s0 }
  0x48   : > { %p1193_p11 = scmp.lt.s32.totalorder %s1191_s26, %s1186_s3 }
  0x49   : > { %p1189_p7 = pnand %p1187_p1, %p1098_p9 }
  0x4a   : > { %p1194_p12 = por %p1193_p11, %p1192_p6 }
  0x4b   : > { %p1190_p10 = pneg %p1189_p7 }
  0x4d   : > { %p1195_p2 = pnand %p1194_p12, %p1190_p10 }
  0x4f   : > { %1198 = shalt.err (!%p1195_p2)
}
  0x50   : > { %999 = dma.hbm_to_vmem [thread:$0]  (!%p1537_p8), %s398_s17, 128, %s400_s29, %s388_s8  }
  0x51   : > { %s433_s30 = scalar_lea.hbm %s1760_s2, %s1535_s14  ;;  %s429_s23 = scalar_lea.vmem [#allocation7], %s1532_s27 }
  0x52   : > { %s435_s16 = sshll.u32 %s433_s30, 4  ;;  %s437_s28 = sshll.u32 %s429_s23, 4  ;;  %s436_s16 = int_to_ptr.hbm [resolvable:$true] %s435_s16  ;;  %s438_s28 = int_to_ptr.vmem [resolvable:$true] %s437_s28 }
  0x53   : > { %s1214_s12 = sshra.s32 %s436_s16, 4  ;;  %s1221_s17 = scalar_lea.hbm %s1760_s2, 16  ;;  %s1215_s12 = int_to_ptr.hbm [resolvable:$true] %s1214_s12 }
  0x54   : > { %s1216_s3 = scalar_lea.hbm %s1215_s12, 8  ;;  %p1222_p10 = scmp.lt.s32.totalorder %s1215_s12, %s1760_s2 }
  0x55   : > { %p1217_p4 = scmp.ne.s32.totalorder %s1215_s12, %s1216_s3  ;;  %p1223_p6 = scmp.lt.s32.totalorder %s1221_s17, %s1216_s3 }
  0x57   : > { %p1219_p1 = pnand %p1217_p4, %p1098_p9  ;;  %p1224_p11 = por %p1223_p6, %p1222_p10 }
  0x59   : > { %p1220_p7 = pneg %p1219_p1 }
  0x5b   : > { %p1225_p12 = pnand %p1224_p11, %p1220_p7 }
  0x5d   : > { %1228 = shalt.err (!%p1225_p12)
}
  0x5e   : > { %1005 = dma.hbm_to_vmem [thread:$0]  (!%p1537_p8), %s436_s16, 128, %s438_s28, %s1550_s22  }
  0x5f   : > { %446 = sbr.rel (%p1478_p3) target bundleno = 304 (0x130), region = 56  ;;  %s1617_s27 = sand.u32 (!%p1478_p3), 1, %s1374_s18  }
  0x60   : > { %s1620_s14 = sshll.u32 (!%p1478_p3), %s1617_s27, 3  ;;  %s449_s11 = scalar_lea.sflag (!%p1478_p3), [#allocation3], %s1617_s27 }
  0x61   : > { %s452_s4 = scalar_lea.vmem (!%p1478_p3), [#allocation2], %s1620_s14 }
  0x64   : > { %1345 = dma.done.wait (%p1514_p13), %s449_s11, 128  }
  0x65   : > { %1347 = vsyncadd (%p1514_p13), %s449_s11, 4294967168  ;;  %s458_s25 = sand.u32 1, %s1473_s24   ;;  %s462_s15 = scalar_lea.vmem [#allocation5], %s1620_s14 }
  0x66   : > { %s459_s22 = scalar_lea.sflag [#allocation6], %s458_s25 }
  0x67   : > { %1349 = dma.done.wait (%p1514_p13), %s459_s22, 256  }
  0x68   : > { %1351 = vsyncadd (%p1514_p13), %s459_s22, 4294967040  ;;  %s472_s1 = scalar_lea.vmem [#allocation7], %s1620_s14  ;;  %p1809_p3 = scmp.eq.s32.totalorder %s1473_s24, 0 }
  0x6a   : > { %1353 = dma.done.wait (%p1809_p3), [#allocation9], 4096   ;;  %p1810_p8 = pmov %p1809_p3 }
  0x6b   : > { %p1811_p9 = pmov %p1809_p3 }
  0x6c   : > { %1355 = vsyncadd (%p1810_p8), [#allocation9], 4294963200 }
  0x6d   : > { %1357 = dma.done.wait (%p1811_p9), [#allocation12], 2048   ;;  %p1812_p2 = pmov %p1809_p3 }
  0x6e   : > { %v647_v0 = vld [vmem:[#allocation11 + $0x78] sm:$0xff]  ;;  %v646_v1 = vld [vmem:[#allocation11 + $0x70] sm:$0xff]  ;;  %v645_v4 = vld [vmem:[#allocation11 + $0x68] sm:$0xff]  ;;  %s957_s21 = sshll.u32 %s1473_s24, 3  ;;  %s539_s26 = scalar_lea.vmem [#allocation14], %s1620_s14 }
  0x6f   : > { %1359 = vsyncadd (%p1812_p2), [#allocation12], 4294965248  ;;  %652 = vmatpush.msra.mxu2 %v647_v0  ;;  %v605_v2 = vld [vmem:[#allocation10 + $0x78] sm:$0xff]  ;;  %v604_v5 = vld [vmem:[#allocation10 + $0x70] sm:$0xff]  ;;  %s708_s16 = scalar_lea.hbm %s1768_s10, %s957_s21  ;;  %s694_s12 = scalar_lea.hbm %s1767_s9, %s957_s21 }
  0x70   : > { %v563_v3 = vld [vmem:[#allocation8 + $0x78] sm:$0xff]  ;;  %610 = vmatpush.msra.mxu1 %v605_v2  ;;  %v562_v6 = vld [vmem:[#allocation8 + $0x70] sm:$0xff]  ;;  %v603_v7 = vld [vmem:[#allocation10 + $0x68] sm:$0xff]  ;;  %s1662_s17 = sshll.u32 %s539_s26, 4  ;;  %s1813_s11 = sld [smem:[#allocation31_spill]]  ;;  %s711_s17 = int_to_ptr.vmem [resolvable:$true] %s1662_s17 }
  0x71   : > { %568 = vmatpush.msra.mxu0 %v563_v3  ;;  %653 = vmatpush.msra.mxu2 %v646_v1  ;;  %v561_v8 = vld [vmem:[#allocation8 + $0x68] sm:$0xff]  ;;  %v644_v9 = vld [vmem:[#allocation11 + $0x60] sm:$0xff]  ;;  %v643_v12 = vld [vmem:[#allocation11 + $0x58] sm:$0xff]  ;;  %s532_s22 = scalar_lea.vmem [#allocation13], %s1620_s14  ;;  %s1814_s23 = sld [smem:[#allocation33_spill]] }
  0x72   : > { %611 = vmatpush.msra.mxu1 %v604_v5  ;;  %v602_v10 = vld [vmem:[#allocation10 + $0x60] sm:$0xff]  ;;  %v601_v13 = vld [vmem:[#allocation10 + $0x58] sm:$0xff]  ;;  %v642_v15 = vld [vmem:[#allocation11 + $0x50] sm:$0xff]  ;;  %s1816_s29 = sld [smem:[#allocation32_spill]] }
  0x73   : > { %569 = vmatpush.msra.mxu0 %v562_v6  ;;  %654 = vmatpush.msra.mxu2 %v645_v4  ;;  %v560_v11 = vld [vmem:[#allocation8 + $0x60] sm:$0xff]  ;;  %v559_v14 = vld [vmem:[#allocation8 + $0x58] sm:$0xff]  ;;  %v600_v16 = vld [vmem:[#allocation10 + $0x50] sm:$0xff] }
  0x74   : > { %612 = vmatpush.msra.mxu1 %v603_v7  ;;  %v558_v17 = vld [vmem:[#allocation8 + $0x50] sm:$0xff]  ;;  %v641_v18 = vld [vmem:[#allocation11 + $0x48] sm:$0xff]  ;;  %v640_v21 = vld [vmem:[#allocation11 + $0x40] sm:$0xff] }
  0x75   : > { %570 = vmatpush.msra.mxu0 %v561_v8  ;;  %655 = vmatpush.msra.mxu2 %v644_v9  ;;  %v599_v19 = vld [vmem:[#allocation10 + $0x48] sm:$0xff]  ;;  %v598_v22 = vld [vmem:[#allocation10 + $0x40] sm:$0xff]  ;;  %v639_v24 = vld [vmem:[#allocation11 + $0x38] sm:$0xff] }
  0x76   : > { %613 = vmatpush.msra.mxu1 %v602_v10  ;;  %v557_v20 = vld [vmem:[#allocation8 + $0x48] sm:$0xff]  ;;  %v556_v23 = vld [vmem:[#allocation8 + $0x40] sm:$0xff]  ;;  %v597_v25 = vld [vmem:[#allocation10 + $0x38] sm:$0xff] }
  0x77   : > { %571 = vmatpush.msra.mxu0 %v560_v11  ;;  %656 = vmatpush.msra.mxu2 %v643_v12  ;;  %v555_v26 = vld [vmem:[#allocation8 + $0x38] sm:$0xff]  ;;  %v638_v27 = vld [vmem:[#allocation11 + $0x30] sm:$0xff]  ;;  %v637_v30 = vld [vmem:[#allocation11 + $0x28] sm:$0xff]  ;;  %s722_s28 = scalar_lea.hbm %s1814_s23, %s957_s21  ;;  %s1693_s21 = scalar_lea.sflag [#allocation15], %s458_s25 }
  0x78   : > { %614 = vmatpush.msra.mxu1 %v601_v13  ;;  %v596_v28 = vld [vmem:[#allocation10 + $0x30] sm:$0xff]  ;;  %v595_v31 = vld [vmem:[#allocation10 + $0x28] sm:$0xff]  ;;  %v636_v33 = vld [vmem:[#allocation11 + $0x20] sm:$0xff] }
  0x79   : > { %572 = vmatpush.msra.mxu0 %v559_v14  ;;  %657 = vmatpush.msra.mxu2 %v642_v15  ;;  %v554_v29 = vld [vmem:[#allocation8 + $0x30] sm:$0xff]  ;;  %v553_v32 = vld [vmem:[#allocation8 + $0x28] sm:$0xff]  ;;  %v594_v34 = vld [vmem:[#allocation10 + $0x20] sm:$0xff] }
  0x7a   : > { %615 = vmatpush.msra.mxu1 %v600_v16  ;;  %v552_v35 = vld [vmem:[#allocation8 + $0x20] sm:$0xff]  ;;  %v635_v36 = vld [vmem:[#allocation11 + $0x18] sm:$0xff]  ;;  %v634_v39 = vld [vmem:[#allocation11 + $0x10] sm:$0xff] }
  0x7b   : > { %573 = vmatpush.msra.mxu0 %v558_v17  ;;  %658 = vmatpush.msra.mxu2 %v641_v18  ;;  %v593_v37 = vld [vmem:[#allocation10 + $0x18] sm:$0xff]  ;;  %v592_v40 = vld [vmem:[#allocation10 + $0x10] sm:$0xff]  ;;  %v633_v42 = vld [vmem:[#allocation11 + $0x8] sm:$0xff] }
  0x7c   : > { %616 = vmatpush.msra.mxu1 %v599_v19  ;;  %v551_v38 = vld [vmem:[#allocation8 + $0x18] sm:$0xff]  ;;  %v550_v41 = vld [vmem:[#allocation8 + $0x10] sm:$0xff]  ;;  %v591_v43 = vld [vmem:[#allocation10 + $0x8] sm:$0xff] }
  0x7d   : > { %574 = vmatpush.msra.mxu0 %v557_v20  ;;  %659 = vmatpush.msra.mxu2 %v640_v21  ;;  %v549_v44 = vld [vmem:[#allocation8 + $0x8] sm:$0xff]  ;;  %v632_v45 = vld [vmem:[#allocation11] sm:$0xff]  ;;  %v631_v46 = vld [vmem:[%s472_s1] sm:$0xff]  ;;  %s1672_s1 = sshll.u32 %s694_s12, 4  ;;  %s1786_s12 = scalar_lea.vmem [#allocation16], %s1620_s14  ;;  %s699_s1 = int_to_ptr.hbm [resolvable:$true] %s1672_s1 }
  0x7e   : > { %617 = vmatpush.msra.mxu1 %v598_v22  ;;  %v590_v47 = vld [vmem:[#allocation10] sm:$0xff]  ;;  %v547_v50 = vld [vmem:[%s452_s4] sm:$0xff]  ;;  %s1667_s4 = sshll.u32 %s708_s16, 4  ;;  %s1687_s8 = sshll.u32 %s1786_s12, 4  ;;  %s713_s4 = int_to_ptr.hbm [resolvable:$true] %s1667_s4  ;;  %s725_s8 = int_to_ptr.vmem [resolvable:$true] %s1687_s8 }
  0x7f   : > { %575 = vmatpush.msra.mxu0 %v556_v23  ;;  %660 = vmatpush.msra.mxu2 %v639_v24  ;;  %v548_v48 = vld [vmem:[#allocation8] sm:$0xff]  ;;  %v1061_v51 = vld [vmem:[%s1764_s6] ss:$0 sm:$0xff]  ;;  %s1258_s20 = sshra.s32 %s713_s4, 4  ;;  %s1259_s20 = int_to_ptr.hbm [resolvable:$true] %s1258_s20 }
  0x80   : > { %618 = vmatpush.msra.mxu1 %v597_v25  ;;  %v589_v49 = vld [vmem:[%s462_s15] sm:$0xff]  ;;  %v1062_v52 = vld [vmem:[%s1813_s11] ss:$0 sm:$0xff]  ;;  %s1670_s15 = sshll.u32 %s532_s22, 4  ;;  %s1689_s11 = sshll.u32 %s722_s28, 4  ;;  %s697_s15 = int_to_ptr.vmem [resolvable:$true] %s1670_s15  ;;  %s727_s11 = int_to_ptr.hbm [resolvable:$true] %s1689_s11 }
  0x81   : > { %576 = vmatpush.msra.mxu0 %v555_v26  ;;  %661 = vmatpush.msra.mxu2 %v638_v27  ;;  %v1063_v57 = vld [vmem:[%s1816_s29] ss:$0 sm:$0xff]  ;;  %s1260_s30 = scalar_lea.hbm %s1259_s20, 8  ;;  %p1265_p7 = scmp.lt.s32.totalorder %s1259_s20, %s1768_s10 }
  0x82   : > { %619 = vmatpush.msra.mxu1 %v596_v28  ;;  %p1261_p13 = scmp.ne.s32.totalorder %s1259_s20, %s1260_s30 }
  0x83   : > { %577 = vmatpush.msra.mxu0 %v554_v29  ;;  %662 = vmatpush.msra.mxu2 %v637_v30 }
  0x84   : > { %620 = vmatpush.msra.mxu1 %v595_v31  ;;  %p1262_p4 = pnand %p1261_p13, %p1518_p0 }
  0x85   : > { %578 = vmatpush.msra.mxu0 %v553_v32  ;;  %663 = vmatpush.msra.mxu2 %v636_v33 }
  0x86   : > { %621 = vmatpush.msra.mxu1 %v594_v34  ;;  %p1263_p1 = pneg %p1262_p4 }
  0x87   : > { %579 = vmatpush.msra.mxu0 %v552_v35  ;;  %664 = vmatpush.msra.mxu2 %v635_v36 }
  0x88   : > { %622 = vmatpush.msra.mxu1 %v593_v37 }
  0x89   : > { %580 = vmatpush.msra.mxu0 %v551_v38  ;;  %665 = vmatpush.msra.mxu2 %v634_v39 }
  0x8a   : > { %623 = vmatpush.msra.mxu1 %v592_v40 }
  0x8b   : > { %581 = vmatpush.msra.mxu0 %v550_v41  ;;  %666 = vmatpush.msra.mxu2 %v633_v42 }
  0x8c   : > { %624 = vmatpush.msra.mxu1 %v591_v43 }
  0x8d   : > { %582 = vmatpush.msra.mxu0 %v549_v44  ;;  %667 = vmatpush.msra.mxu2 %v632_v45 }
  0x8e   : > { %668 = vmatmul.f32.vlgmr.msra.gmra.mxu2 %v631_v46  ;;  %625 = vmatpush.msra.mxu1 %v590_v47 }
  0x8f   : > { %583 = vmatpush.msra.mxu0 %v548_v48  ;;  %626 = vmatmul.f32.vlgmr.msra.gmra.mxu1 %v589_v49 }
  0x90   : > { %584 = vmatmul.f32.vlgmr.msra.gmra.mxu0 %v547_v50 }
 0x10c   : > { %v627_v53 = vpop.f32.mrf.mxu1 }
 0x10d   : > { %v628_v54 = vadd.f32 %v1061_v51, %v627_v53  ;;  %v585_v55 = vpop.f32.mrf.mxu0 }
 0x10e   : > { %v586_v56 = vadd.f32 %v1062_v52, %v585_v55 }
 0x10f   : > { %630 = vst [vmem:[%s539_s26] sm:$0xff] %v628_v54  ;;  %s1264_s26 = scalar_lea.hbm %s1768_s10, 16 }
 0x110   : > { %588 = vst [vmem:[%s532_s22] sm:$0xff] %v586_v56  ;;  %p1266_p10 = scmp.lt.s32.totalorder %s1264_s26, %s1260_s30 }
 0x112   : > { %p1267_p6 = por %p1266_p10, %p1265_p7 }
 0x114   : > { %p1268_p11 = pnand %p1267_p6, %p1263_p1 }
 0x116   : > { %1271 = shalt.err (!%p1268_p11)
}
 0x117   : > { %981 = dma.vmem_to_hbm [thread:$0]  (%p1518_p0), %s711_s17, 128, %s713_s4, %s1693_s21   ;;  %v669_v58 = vpop.f32.mrf.mxu2 }
 0x118   : > { %s674_s24 = scalar_lea.sflag [#allocation4], %s1617_s27  ;;  %s1286_s25 = sshra.s32 %s699_s1, 4  ;;  %s1287_s25 = int_to_ptr.hbm [resolvable:$true] %s1286_s25 }
 0x119   : > { %s1288_s22 = scalar_lea.hbm %s1287_s25, 8  ;;  %s1292_s20 = scalar_lea.hbm %s1767_s9, 16 }
 0x11a   : > { %p1289_p12 = scmp.ne.s32.totalorder %s1287_s25, %s1288_s22  ;;  %p1293_p9 = scmp.lt.s32.totalorder %s1287_s25, %s1767_s9 }
 0x11b   : > { %p1294_p2 = scmp.lt.s32.totalorder %s1292_s20, %s1288_s22 }
 0x11c   : > { %p1290_p3 = pnand %p1289_p12, %p1518_p0 }
 0x11d   : > { %p1295_p13 = por %p1294_p2, %p1293_p9 }
 0x11e   : > { %p1291_p8 = pneg %p1290_p3 }
 0x120   : > { %p1296_p4 = pnand %p1295_p13, %p1291_p8 }
 0x122   : > { %1299 = shalt.err (!%p1296_p4)
}
 0x123   : > { %980 = dma.vmem_to_hbm [thread:$0]  (%p1518_p0), %s697_s15, 128, %s699_s1, %s674_s24   ;;  %v670_v59 = vadd.f32 %v1063_v57, %v669_v58 }
 0x124   : > { %s1817_s27 = scalar_lea.vmem [#allocation16], %s1620_s14  ;;  %s1314_s17 = sshra.s32 %s727_s11, 4  ;;  %s1315_s17 = int_to_ptr.hbm [resolvable:$true] %s1314_s17 }
 0x125   : > { %672 = vst [vmem:[%s1817_s27] sm:$0xff] %v670_v59  ;;  %s1316_s4 = scalar_lea.hbm %s1315_s17, 8  ;;  %s1320_s29 = scalar_lea.hbm %s1814_s23, 16 }
 0x126   : > { %p1317_p1 = scmp.ne.s32.totalorder %s1315_s17, %s1316_s4  ;;  %p1321_p6 = scmp.lt.s32.totalorder %s1315_s17, %s1814_s23 }
 0x127   : > { %p1322_p11 = scmp.lt.s32.totalorder %s1320_s29, %s1316_s4 }
 0x128   : > { %p1318_p7 = pnand %p1317_p1, %p1518_p0 }
 0x129   : > { %p1323_p12 = por %p1322_p11, %p1321_p6 }
 0x12a   : > { %p1319_p10 = pneg %p1318_p7 }
 0x12c   : > { %p1324_p3 = pnand %p1323_p12, %p1319_p10 }
 0x12e   : > { %1327 = shalt.err (!%p1324_p3)
}
 0x12f   : > { %982 = dma.vmem_to_hbm [thread:$0]  (%p1518_p0), %s725_s8, 128, %s727_s11, %s1693_s21  }
 0x130 PF: > { %s1818_s14 = sld [smem:[#allocation23_spill]] }
 0x131   : > { %s1820_s1 = sld [smem:[#allocation24_spill]] }
 0x136   : > { %s738_s24 = sand.u32 1, %s1818_s14  }
 0x137   : > { %p1821_p8 = scmp.ge.s32.totalorder %s1820_s1, 2  ;;  %s739_s28 = scalar_lea.sflag [#allocation4], %s738_s24 }
 0x139   : > { %p1007_p9 = pnand %p1821_p8, %p1526_p5 }
 0x13b   : > { %p1008_p2 = pneg %p1007_p9 }
 0x13d   : > { %1361 = dma.done.wait (%p1008_p2), %s739_s28, 128  }
 0x13e   : > { %1363 = vsyncadd (%p1008_p2), %s739_s28, 4294967168  ;;  %s1822_s12 = sadd.s32 4294967294, %s1820_s1  }
 0x13f   : > { %s748_s20 = sand.u32 1, %s1822_s12  }
 0x140   : > { %s749_s30 = scalar_lea.sflag [#allocation15], %s748_s20 }
 0x141   : > { %1365 = dma.done.wait (%p1008_p2), %s749_s30, 256  }
 0x142   : > { %1367 = vsyncadd (%p1008_p2), %s749_s30, 4294967040  ;;  %s1823_s20 = sld [smem:[#allocation25_spill]]  ;;  %s1825_s17 = smov %s1374_s18 }
 0x143   : > { %s1824_s16 = sld [smem:[#allocation26_spill]]  ;;  %s1826_s18 = smov %s1378_s19 }
 0x148   : > { %p33_p0 = scmp.ge.s32.totalorder %s1823_s20, 4  }
 0x149   : > { %s1827_s19 = smov %s1824_s16 }
 0x14a   :  { %35 = sbr.rel (!%p33_p0) target bundleno = 17 (0x11), region = 169 }
 0x14f   :  { %765 = vsyncpa [#allocation3], 1 }
 0x150   :  { %767 = vsyncpa [#allocation3 + $0x1], 1 }
 0x151   :  { %768 = vsyncpa [#allocation6], 1 }
 0x152   :  { %770 = vsyncpa [#allocation6 + $0x1], 1 }
 0x153   :  { %771 = vsyncpa [#allocation9], 1 }
 0x154   :  { %772 = vsyncpa [#allocation12], 1 }
 0x155   :  { %773 = vsyncpa [#allocation4], 1 }
 0x156   :  { %775 = vsyncpa [#allocation4 + $0x1], 1 }
 0x157   :  { %776 = vsyncpa [#allocation15], 1 }
 0x158   :  { %778 = vsyncpa [#allocation15 + $0x1], 1 }

</bundles_post_ra>
